<compile_context>
chip_gen: v7x
topology: tpu7x:2x2x1
jax: 0.10.0
libtpu: 0.0.40
codegen_flags: <defaults>
</compile_context>

<pallas_src>
import math

import jax
import jax.numpy as jnp
from jax.experimental import pallas as pl
from jax.experimental.pallas import tpu as pltpu


def _shifted_softplus(x):
    # softplus(x) - log(2), numerically stable; f32 elementwise (VPU + EUP).
    return jnp.maximum(x, 0.0) + jnp.log1p(jnp.exp(-jnp.abs(x))) - math.log(2.0)


def atomwise_kernel(x_ref, mask_ref, w1_ref, b1_ref, w2_ref, c2_ref, y_ref):
    """One grid step == TB molecules.

    x_ref    : (A, TB, n_in)     compute dtype (f32 or bf16)
    mask_ref : (A, TB, 1)        f32
    w1_ref   : (n_in, n_hidden)  compute dtype
    b1_ref   : (1, n_hidden)     f32
    w2_ref   : (n_hidden, n_out) f32  (pre-scaled by stddev)
    c2_ref   : (1, n_out)        f32  (= stddev * b2 + mean)
    y_ref    : (TB, n_out)       f32
    """
    n_atoms = x_ref.shape[0]
    tb = x_ref.shape[1]
    n_hidden = w1_ref.shape[1]

    # Hoist weight loads out of the atom loop.
    w1 = w1_ref[...]
    b1 = b1_ref[...]

    def atom_step(a, carry):
        acc, msum = carry
        # (TB, n_in) @ (n_in, n_hidden) -> f32 accumulation on the MXU.
        h = jnp.dot(x_ref[a], w1, preferred_element_type=jnp.float32) + b1
        h = _shifted_softplus(h)
        m = mask_ref[a]                              # (TB, 1) f32
        return acc + m * h, msum + m

    init = (jnp.zeros((tb, n_hidden), jnp.float32),
            jnp.zeros((tb, 1), jnp.float32))
    acc, msum = jax.lax.fori_loop(0, n_atoms, atom_step, init,
                                  unroll=(n_atoms <= 16))

    # Fused linear tail: 2nd MLP layer + ScaleShift + mask + atom-sum.
    # One small matmul per TB molecules (instead of one per molecule).
    y = jnp.dot(acc, w2_ref[...], preferred_element_type=jnp.float32)
    y_ref[...] = y + msum * c2_ref[...]


def _round_up(x, m):
    return -(-x // m) * m


def _choose_tb(batch, n_atoms):
    """Molecules per grid step.

    Aim for ~512 atom-rows of matmul M per step (amortizes per-step overhead,
    fills the MXU), keep TB a multiple of 8 sublanes whenever the batch is
    tiled, and keep >= 2 grid steps when possible so v7x's two TensorCores both
    get work through dimension_semantics=("parallel",).
    """
    target = _round_up(max(1, -(-512 // n_atoms)), 8)
    if target < batch:
        return target
    if batch >= 16:
        return _round_up(-(-batch // 2), 8)
    return batch


def atomwise_forward(representation, atom_mask, params, *,
                     compute_dtype=jnp.float32, tb=None):
    """representation: [B, A, n_in], atom_mask: [B, A]  ->  y: [B, n_out] (f32)."""
    B, A, n_in = representation.shape
    w1, b1, w2, b2 = params["w1"], params["b1"], params["w2"], params["b2"]
    mean, stddev = params["mean"], params["stddev"]
    n_hidden = w1.shape[1]
    n_out = w2.shape[1]

    if tb is None:
        tb = _choose_tb(B, A)
    bp = _round_up(B, tb)
    num_blocks = bp // tb

    # Fold ScaleShift into the (tiny) output-layer parameters on the host:
    #   y = acc @ (stddev * w2) + msum * (stddev * b2 + mean)
    # -> no mean/stddev VMEM tile or extra input stream inside the kernel.
    w2f = (w2.astype(jnp.float32) * stddev).astype(jnp.float32)
    c2 = (b2.astype(jnp.float32) * stddev + mean).reshape(1, n_out).astype(jnp.float32)

    x = representation.astype(compute_dtype)
    w1c = w1.astype(compute_dtype)
    b1f = b1.astype(jnp.float32).reshape(1, n_hidden)
    mask = atom_mask.astype(jnp.float32)

    if bp != B:
        # Padded molecules have mask == 0, so they contribute exactly 0.
        x = jnp.pad(x, ((0, bp - B), (0, 0), (0, 0)))
        mask = jnp.pad(mask, ((0, bp - B), (0, 0)))

    # Atoms-major layout so the per-molecule masked reduction is an accumulation
    # over the leading ref axis (no in-kernel reshapes / transposes).
    x_t = jnp.transpose(x, (1, 0, 2))                 # (A, Bp, n_in)
    mask_t = jnp.transpose(mask, (1, 0))[:, :, None]  # (A, Bp, 1)

    y = pl.pallas_call(
        atomwise_kernel,
        out_shape=jax.ShapeDtypeStruct((bp, n_out), jnp.float32),
        grid_spec=pltpu.PrefetchScalarGridSpec(
            num_scalar_prefetch=0,
            grid=(num_blocks,),
            in_specs=[
                pl.BlockSpec((A, tb, n_in), lambda g: (0, g, 0)),
                pl.BlockSpec((A, tb, 1), lambda g: (0, g, 0)),
                pl.BlockSpec((n_in, n_hidden), lambda g: (0, 0)),
                pl.BlockSpec((1, n_hidden), lambda g: (0, 0)),
                pl.BlockSpec((n_hidden, n_out), lambda g: (0, 0)),
                pl.BlockSpec((1, n_out), lambda g: (0, 0)),
            ],
            out_specs=pl.BlockSpec((tb, n_out), lambda g: (g, 0)),
        ),
        compiler_params=pltpu.CompilerParams(
            dimension_semantics=("parallel",)),
    )(x_t, mask_t, w1c, b1f, w2f, c2)

    return y[:B]


def atomwise_reference(representation, atom_mask, params):
    """Plain-JAX reference of the same forward pass (per-atom formulation)."""
    h = representation @ params["w1"] + params["b1"]
    h = _shifted_softplus(h)
    yi = h @ params["w2"] + params["b2"]
    yi = yi * params["stddev"] + params["mean"]
    yi = yi * atom_mask[..., None]
    return jnp.sum(yi, axis=1)


if __name__ == "__main__":
    key = jax.random.PRNGKey(0)
    kx, k1, k2, k3, k4, kx2, km2 = jax.random.split(key, 7)

    # Small config: batch=2, atoms=8, n_in=32, hidden=n_in//2=16, n_out=1
    B, A, n_in, n_out = 2, 8, 32, 1
    n_hidden = n_in // 2

    representation = jax.random.normal(kx, (B, A, n_in), dtype=jnp.float32)
    atom_mask = jnp.ones((B, A), dtype=jnp.float32)
    atom_mask = atom_mask.at[1, A - 2:].set(0.0)   # padding atoms in molecule 1

    params = {
        "w1": jax.random.normal(k1, (n_in, n_hidden), dtype=jnp.float32) * 0.1,
        "b1": jax.random.normal(k2, (1, n_hidden), dtype=jnp.float32) * 0.01,
        "w2": jax.random.normal(k3, (n_hidden, n_out), dtype=jnp.float32) * 0.1,
        "b2": jax.random.normal(k4, (1, n_out), dtype=jnp.float32) * 0.01,
        "mean": jnp.zeros((), dtype=jnp.float32),      # ScaleShift defaults
        "stddev": jnp.ones((), dtype=jnp.float32),
    }

    # f32 path, tiny batch (single grid step, TB == B)
    y = jax.block_until_ready(atomwise_forward(representation, atom_mask, params))
    y_ref = atomwise_reference(representation, atom_mask, params)
    assert y.shape == (B, n_out), y.shape
    assert jnp.allclose(y, y_ref, atol=1e-5, rtol=1e-5), (y, y_ref)

    # Larger batch with non-trivial mean/stddev: exercises TB-batching, batch
    # padding (20 -> 32) and a multi-step (2-step) parallel grid.
    B2 = 20
    rep2 = jax.random.normal(kx2, (B2, A, n_in), dtype=jnp.float32)
    mask2 = (jax.random.uniform(km2, (B2, A)) > 0.2).astype(jnp.float32)
    params2 = dict(params,
                   mean=jnp.asarray(-1.5, jnp.float32),
                   stddev=jnp.asarray(2.5, jnp.float32))
    y2 = jax.block_until_ready(atomwise_forward(rep2, mask2, params2))
    y2_ref = atomwise_reference(rep2, mask2, params2)
    assert y2.shape == (B2, n_out)
    assert jnp.allclose(y2, y2_ref, atol=1e-4, rtol=1e-4), (y2, y2_ref)

    # bf16 representation / w1 (v6e/v7x HBM-traffic optimization). MXU still
    # accumulates in f32 and the activation path stays f32, so only the
    # matmul-input rounding differs -> loose tolerance vs the f32 reference.
    y_bf16 = jax.block_until_ready(
        atomwise_forward(rep2, mask2, params2, compute_dtype=jnp.bfloat16))
    assert jnp.allclose(y_bf16, y2_ref, atol=0.25, rtol=0.05), (y_bf16, y2_ref)

    print("KERNEL_OK")
</pallas_src>

<mosaic_0001>
module attributes {stable_mosaic.version = 11 : i64} {
  func.func @atomwise_kernel(%arg0: i32, %arg1: memref<8x2x32xf32, #tpu.memory_space<vmem>>, %arg2: memref<8x2x1xf32, #tpu.memory_space<vmem>>, %arg3: memref<32x16xf32, #tpu.memory_space<vmem>>, %arg4: memref<1x16xf32, #tpu.memory_space<vmem>>, %arg5: memref<16x1xf32, #tpu.memory_space<vmem>>, %arg6: memref<1x1xf32, #tpu.memory_space<vmem>>, %arg7: memref<2x1xf32, #tpu.memory_space<vmem>>) attributes {dimension_semantics = [#tpu.dimension_semantics<parallel>], iteration_bounds = array<i64: 1>, scalar_prefetch = 0 : i64, scratch_operands = 0 : i64, tpu.core_type = #tpu.core_type<tc>, window_params = [{transform_indices = @transform_0, window_bounds = array<i64: 8, 2, 32>}, {transform_indices = @transform_1, window_bounds = array<i64: 8, 2, 1>}, {pipeline_mode = #tpu.pipeline_mode<synchronous>, transform_indices = @transform_2, window_bounds = array<i64: 32, 16>}, {pipeline_mode = #tpu.pipeline_mode<synchronous>, transform_indices = @transform_3, window_bounds = array<i64: 1, 16>}, {pipeline_mode = #tpu.pipeline_mode<synchronous>, transform_indices = @transform_4, window_bounds = array<i64: 16, 1>}, {pipeline_mode = #tpu.pipeline_mode<synchronous>, transform_indices = @transform_5, window_bounds = array<i64: 1, 1>}, {transform_indices = @transform_6, window_bounds = array<i64: 2, 1>}]} {
    %c0 = arith.constant 0 : index
    %c0_0 = arith.constant 0 : index
    %0 = vector.load %arg3[%c0, %c0_0] : memref<32x16xf32, #tpu.memory_space<vmem>>, vector<32x16xf32>
    %c0_1 = arith.constant 0 : index
    %c0_2 = arith.constant 0 : index
    %1 = vector.load %arg4[%c0_1, %c0_2] : memref<1x16xf32, #tpu.memory_space<vmem>>, vector<1x16xf32>
    %cst = arith.constant 0.000000e+00 : f32
    %2 = vector.broadcast %cst : f32 to vector<2x16xf32>
    %cst_3 = arith.constant 0.000000e+00 : f32
    %3 = vector.broadcast %cst_3 : f32 to vector<2x1xf32>
    %c0_i32 = arith.constant 0 : i32
    %4 = arith.index_cast %c0_i32 : i32 to index
    %c0_4 = arith.constant 0 : index
    %c0_5 = arith.constant 0 : index
    %5 = vector.load %arg1[%4, %c0_4, %c0_5] : memref<8x2x32xf32, #tpu.memory_space<vmem>>, vector<1x2x32xf32>
    %6 = vector.shape_cast %5 : vector<1x2x32xf32> to vector<2x32xf32>
    %cst_6 = arith.constant dense<0.000000e+00> : vector<2x16xf32>
    %7 = tpu.matmul %6, %0, %cst_6 {dimension_numbers = #tpu.dot_dimension_numbers<[1], [0], [0], [1], [0, 0, 1, 1], [], []>} : vector<2x32xf32>, vector<32x16xf32>, vector<2x16xf32> -> vector<2x16xf32>
    %8 = vector.broadcast %1 : vector<1x16xf32> to vector<2x16xf32>
    %9 = arith.addf %7, %8 : vector<2x16xf32>
    %cst_7 = arith.constant 0.000000e+00 : f32
    %10 = vector.broadcast %cst_7 : f32 to vector<2x16xf32>
    %11 = arith.maximumf %9, %10 : vector<2x16xf32>
    %12 = math.absf %9 : vector<2x16xf32>
    %cst_8 = arith.constant 0.000000e+00 : f32
    %13 = vector.broadcast %cst_8 : f32 to vector<2x16xf32>
    %14 = arith.subf %13, %12 : vector<2x16xf32>
    %15 = math.exp %14 : vector<2x16xf32>
    %16 = math.log1p %15 : vector<2x16xf32>
    %17 = arith.addf %11, %16 : vector<2x16xf32>
    %cst_9 = arith.constant 0.693147182 : f32
    %18 = vector.broadcast %cst_9 : f32 to vector<2x16xf32>
    %19 = arith.subf %17, %18 : vector<2x16xf32>
    %20 = arith.index_cast %c0_i32 : i32 to index
    %c0_10 = arith.constant 0 : index
    %c0_11 = arith.constant 0 : index
    %21 = vector.load %arg2[%20, %c0_10, %c0_11] : memref<8x2x1xf32, #tpu.memory_space<vmem>>, vector<1x2x1xf32>
    %22 = vector.shape_cast %21 : vector<1x2x1xf32> to vector<2x1xf32>
    %23 = vector.broadcast %22 : vector<2x1xf32> to vector<2x16xf32>
    %24 = arith.mulf %23, %19 : vector<2x16xf32>
    %25 = arith.addf %2, %24 : vector<2x16xf32>
    %26 = arith.addf %3, %22 : vector<2x1xf32>
    %c1_i32 = arith.constant 1 : i32
    %27 = arith.index_cast %c1_i32 : i32 to index
    %c0_12 = arith.constant 0 : index
    %c0_13 = arith.constant 0 : index
    %28 = vector.load %arg1[%27, %c0_12, %c0_13] : memref<8x2x32xf32, #tpu.memory_space<vmem>>, vector<1x2x32xf32>
    %29 = vector.shape_cast %28 : vector<1x2x32xf32> to vector<2x32xf32>
    %cst_14 = arith.constant dense<0.000000e+00> : vector<2x16xf32>
    %30 = tpu.matmul %29, %0, %cst_14 {dimension_numbers = #tpu.dot_dimension_numbers<[1], [0], [0], [1], [0, 0, 1, 1], [], []>} : vector<2x32xf32>, vector<32x16xf32>, vector<2x16xf32> -> vector<2x16xf32>
    %31 = vector.broadcast %1 : vector<1x16xf32> to vector<2x16xf32>
    %32 = arith.addf %30, %31 : vector<2x16xf32>
    %cst_15 = arith.constant 0.000000e+00 : f32
    %33 = vector.broadcast %cst_15 : f32 to vector<2x16xf32>
    %34 = arith.maximumf %32, %33 : vector<2x16xf32>
    %35 = math.absf %32 : vector<2x16xf32>
    %cst_16 = arith.constant 0.000000e+00 : f32
    %36 = vector.broadcast %cst_16 : f32 to vector<2x16xf32>
    %37 = arith.subf %36, %35 : vector<2x16xf32>
    %38 = math.exp %37 : vector<2x16xf32>
    %39 = math.log1p %38 : vector<2x16xf32>
    %40 = arith.addf %34, %39 : vector<2x16xf32>
    %cst_17 = arith.constant 0.693147182 : f32
    %41 = vector.broadcast %cst_17 : f32 to vector<2x16xf32>
    %42 = arith.subf %40, %41 : vector<2x16xf32>
    %43 = arith.index_cast %c1_i32 : i32 to index
    %c0_18 = arith.constant 0 : index
    %c0_19 = arith.constant 0 : index
    %44 = vector.load %arg2[%43, %c0_18, %c0_19] : memref<8x2x1xf32, #tpu.memory_space<vmem>>, vector<1x2x1xf32>
    %45 = vector.shape_cast %44 : vector<1x2x1xf32> to vector<2x1xf32>
    %46 = vector.broadcast %45 : vector<2x1xf32> to vector<2x16xf32>
    %47 = arith.mulf %46, %42 : vector<2x16xf32>
    %48 = arith.addf %25, %47 : vector<2x16xf32>
    %49 = arith.addf %26, %45 : vector<2x1xf32>
    %c2_i32 = arith.constant 2 : i32
    %50 = arith.index_cast %c2_i32 : i32 to index
    %c0_20 = arith.constant 0 : index
    %c0_21 = arith.constant 0 : index
    %51 = vector.load %arg1[%50, %c0_20, %c0_21] : memref<8x2x32xf32, #tpu.memory_space<vmem>>, vector<1x2x32xf32>
    %52 = vector.shape_cast %51 : vector<1x2x32xf32> to vector<2x32xf32>
    %cst_22 = arith.constant dense<0.000000e+00> : vector<2x16xf32>
    %53 = tpu.matmul %52, %0, %cst_22 {dimension_numbers = #tpu.dot_dimension_numbers<[1], [0], [0], [1], [0, 0, 1, 1], [], []>} : vector<2x32xf32>, vector<32x16xf32>, vector<2x16xf32> -> vector<2x16xf32>
    %54 = vector.broadcast %1 : vector<1x16xf32> to vector<2x16xf32>
    %55 = arith.addf %53, %54 : vector<2x16xf32>
    %cst_23 = arith.constant 0.000000e+00 : f32
    %56 = vector.broadcast %cst_23 : f32 to vector<2x16xf32>
    %57 = arith.maximumf %55, %56 : vector<2x16xf32>
    %58 = math.absf %55 : vector<2x16xf32>
    %cst_24 = arith.constant 0.000000e+00 : f32
    %59 = vector.broadcast %cst_24 : f32 to vector<2x16xf32>
    %60 = arith.subf %59, %58 : vector<2x16xf32>
    %61 = math.exp %60 : vector<2x16xf32>
    %62 = math.log1p %61 : vector<2x16xf32>
    %63 = arith.addf %57, %62 : vector<2x16xf32>
    %cst_25 = arith.constant 0.693147182 : f32
    %64 = vector.broadcast %cst_25 : f32 to vector<2x16xf32>
    %65 = arith.subf %63, %64 : vector<2x16xf32>
    %66 = arith.index_cast %c2_i32 : i32 to index
    %c0_26 = arith.constant 0 : index
    %c0_27 = arith.constant 0 : index
    %67 = vector.load %arg2[%66, %c0_26, %c0_27] : memref<8x2x1xf32, #tpu.memory_space<vmem>>, vector<1x2x1xf32>
    %68 = vector.shape_cast %67 : vector<1x2x1xf32> to vector<2x1xf32>
    %69 = vector.broadcast %68 : vector<2x1xf32> to vector<2x16xf32>
    %70 = arith.mulf %69, %65 : vector<2x16xf32>
    %71 = arith.addf %48, %70 : vector<2x16xf32>
    %72 = arith.addf %49, %68 : vector<2x1xf32>
    %c3_i32 = arith.constant 3 : i32
    %73 = arith.index_cast %c3_i32 : i32 to index
    %c0_28 = arith.constant 0 : index
    %c0_29 = arith.constant 0 : index
    %74 = vector.load %arg1[%73, %c0_28, %c0_29] : memref<8x2x32xf32, #tpu.memory_space<vmem>>, vector<1x2x32xf32>
    %75 = vector.shape_cast %74 : vector<1x2x32xf32> to vector<2x32xf32>
    %cst_30 = arith.constant dense<0.000000e+00> : vector<2x16xf32>
    %76 = tpu.matmul %75, %0, %cst_30 {dimension_numbers = #tpu.dot_dimension_numbers<[1], [0], [0], [1], [0, 0, 1, 1], [], []>} : vector<2x32xf32>, vector<32x16xf32>, vector<2x16xf32> -> vector<2x16xf32>
    %77 = vector.broadcast %1 : vector<1x16xf32> to vector<2x16xf32>
    %78 = arith.addf %76, %77 : vector<2x16xf32>
    %cst_31 = arith.constant 0.000000e+00 : f32
    %79 = vector.broadcast %cst_31 : f32 to vector<2x16xf32>
    %80 = arith.maximumf %78, %79 : vector<2x16xf32>
    %81 = math.absf %78 : vector<2x16xf32>
    %cst_32 = arith.constant 0.000000e+00 : f32
    %82 = vector.broadcast %cst_32 : f32 to vector<2x16xf32>
    %83 = arith.subf %82, %81 : vector<2x16xf32>
    %84 = math.exp %83 : vector<2x16xf32>
    %85 = math.log1p %84 : vector<2x16xf32>
    %86 = arith.addf %80, %85 : vector<2x16xf32>
    %cst_33 = arith.constant 0.693147182 : f32
    %87 = vector.broadcast %cst_33 : f32 to vector<2x16xf32>
    %88 = arith.subf %86, %87 : vector<2x16xf32>
    %89 = arith.index_cast %c3_i32 : i32 to index
    %c0_34 = arith.constant 0 : index
    %c0_35 = arith.constant 0 : index
    %90 = vector.load %arg2[%89, %c0_34, %c0_35] : memref<8x2x1xf32, #tpu.memory_space<vmem>>, vector<1x2x1xf32>
    %91 = vector.shape_cast %90 : vector<1x2x1xf32> to vector<2x1xf32>
    %92 = vector.broadcast %91 : vector<2x1xf32> to vector<2x16xf32>
    %93 = arith.mulf %92, %88 : vector<2x16xf32>
    %94 = arith.addf %71, %93 : vector<2x16xf32>
    %95 = arith.addf %72, %91 : vector<2x1xf32>
    %c4_i32 = arith.constant 4 : i32
    %96 = arith.index_cast %c4_i32 : i32 to index
    %c0_36 = arith.constant 0 : index
    %c0_37 = arith.constant 0 : index
    %97 = vector.load %arg1[%96, %c0_36, %c0_37] : memref<8x2x32xf32, #tpu.memory_space<vmem>>, vector<1x2x32xf32>
    %98 = vector.shape_cast %97 : vector<1x2x32xf32> to vector<2x32xf32>
    %cst_38 = arith.constant dense<0.000000e+00> : vector<2x16xf32>
    %99 = tpu.matmul %98, %0, %cst_38 {dimension_numbers = #tpu.dot_dimension_numbers<[1], [0], [0], [1], [0, 0, 1, 1], [], []>} : vector<2x32xf32>, vector<32x16xf32>, vector<2x16xf32> -> vector<2x16xf32>
    %100 = vector.broadcast %1 : vector<1x16xf32> to vector<2x16xf32>
    %101 = arith.addf %99, %100 : vector<2x16xf32>
    %cst_39 = arith.constant 0.000000e+00 : f32
    %102 = vector.broadcast %cst_39 : f32 to vector<2x16xf32>
    %103 = arith.maximumf %101, %102 : vector<2x16xf32>
    %104 = math.absf %101 : vector<2x16xf32>
    %cst_40 = arith.constant 0.000000e+00 : f32
    %105 = vector.broadcast %cst_40 : f32 to vector<2x16xf32>
    %106 = arith.subf %105, %104 : vector<2x16xf32>
    %107 = math.exp %106 : vector<2x16xf32>
    %108 = math.log1p %107 : vector<2x16xf32>
    %109 = arith.addf %103, %108 : vector<2x16xf32>
    %cst_41 = arith.constant 0.693147182 : f32
    %110 = vector.broadcast %cst_41 : f32 to vector<2x16xf32>
    %111 = arith.subf %109, %110 : vector<2x16xf32>
    %112 = arith.index_cast %c4_i32 : i32 to index
    %c0_42 = arith.constant 0 : index
    %c0_43 = arith.constant 0 : index
    %113 = vector.load %arg2[%112, %c0_42, %c0_43] : memref<8x2x1xf32, #tpu.memory_space<vmem>>, vector<1x2x1xf32>
    %114 = vector.shape_cast %113 : vector<1x2x1xf32> to vector<2x1xf32>
    %115 = vector.broadcast %114 : vector<2x1xf32> to vector<2x16xf32>
    %116 = arith.mulf %115, %111 : vector<2x16xf32>
    %117 = arith.addf %94, %116 : vector<2x16xf32>
    %118 = arith.addf %95, %114 : vector<2x1xf32>
    %c5_i32 = arith.constant 5 : i32
    %119 = arith.index_cast %c5_i32 : i32 to index
    %c0_44 = arith.constant 0 : index
    %c0_45 = arith.constant 0 : index
    %120 = vector.load %arg1[%119, %c0_44, %c0_45] : memref<8x2x32xf32, #tpu.memory_space<vmem>>, vector<1x2x32xf32>
    %121 = vector.shape_cast %120 : vector<1x2x32xf32> to vector<2x32xf32>
    %cst_46 = arith.constant dense<0.000000e+00> : vector<2x16xf32>
    %122 = tpu.matmul %121, %0, %cst_46 {dimension_numbers = #tpu.dot_dimension_numbers<[1], [0], [0], [1], [0, 0, 1, 1], [], []>} : vector<2x32xf32>, vector<32x16xf32>, vector<2x16xf32> -> vector<2x16xf32>
    %123 = vector.broadcast %1 : vector<1x16xf32> to vector<2x16xf32>
    %124 = arith.addf %122, %123 : vector<2x16xf32>
    %cst_47 = arith.constant 0.000000e+00 : f32
    %125 = vector.broadcast %cst_47 : f32 to vector<2x16xf32>
    %126 = arith.maximumf %124, %125 : vector<2x16xf32>
    %127 = math.absf %124 : vector<2x16xf32>
    %cst_48 = arith.constant 0.000000e+00 : f32
    %128 = vector.broadcast %cst_48 : f32 to vector<2x16xf32>
    %129 = arith.subf %128, %127 : vector<2x16xf32>
    %130 = math.exp %129 : vector<2x16xf32>
    %131 = math.log1p %130 : vector<2x16xf32>
    %132 = arith.addf %126, %131 : vector<2x16xf32>
    %cst_49 = arith.constant 0.693147182 : f32
    %133 = vector.broadcast %cst_49 : f32 to vector<2x16xf32>
    %134 = arith.subf %132, %133 : vector<2x16xf32>
    %135 = arith.index_cast %c5_i32 : i32 to index
    %c0_50 = arith.constant 0 : index
    %c0_51 = arith.constant 0 : index
    %136 = vector.load %arg2[%135, %c0_50, %c0_51] : memref<8x2x1xf32, #tpu.memory_space<vmem>>, vector<1x2x1xf32>
    %137 = vector.shape_cast %136 : vector<1x2x1xf32> to vector<2x1xf32>
    %138 = vector.broadcast %137 : vector<2x1xf32> to vector<2x16xf32>
    %139 = arith.mulf %138, %134 : vector<2x16xf32>
    %140 = arith.addf %117, %139 : vector<2x16xf32>
    %141 = arith.addf %118, %137 : vector<2x1xf32>
    %c6_i32 = arith.constant 6 : i32
    %142 = arith.index_cast %c6_i32 : i32 to index
    %c0_52 = arith.constant 0 : index
    %c0_53 = arith.constant 0 : index
    %143 = vector.load %arg1[%142, %c0_52, %c0_53] : memref<8x2x32xf32, #tpu.memory_space<vmem>>, vector<1x2x32xf32>
    %144 = vector.shape_cast %143 : vector<1x2x32xf32> to vector<2x32xf32>
    %cst_54 = arith.constant dense<0.000000e+00> : vector<2x16xf32>
    %145 = tpu.matmul %144, %0, %cst_54 {dimension_numbers = #tpu.dot_dimension_numbers<[1], [0], [0], [1], [0, 0, 1, 1], [], []>} : vector<2x32xf32>, vector<32x16xf32>, vector<2x16xf32> -> vector<2x16xf32>
    %146 = vector.broadcast %1 : vector<1x16xf32> to vector<2x16xf32>
    %147 = arith.addf %145, %146 : vector<2x16xf32>
    %cst_55 = arith.constant 0.000000e+00 : f32
    %148 = vector.broadcast %cst_55 : f32 to vector<2x16xf32>
    %149 = arith.maximumf %147, %148 : vector<2x16xf32>
    %150 = math.absf %147 : vector<2x16xf32>
    %cst_56 = arith.constant 0.000000e+00 : f32
    %151 = vector.broadcast %cst_56 : f32 to vector<2x16xf32>
    %152 = arith.subf %151, %150 : vector<2x16xf32>
    %153 = math.exp %152 : vector<2x16xf32>
    %154 = math.log1p %153 : vector<2x16xf32>
    %155 = arith.addf %149, %154 : vector<2x16xf32>
    %cst_57 = arith.constant 0.693147182 : f32
    %156 = vector.broadcast %cst_57 : f32 to vector<2x16xf32>
    %157 = arith.subf %155, %156 : vector<2x16xf32>
    %158 = arith.index_cast %c6_i32 : i32 to index
    %c0_58 = arith.constant 0 : index
    %c0_59 = arith.constant 0 : index
    %159 = vector.load %arg2[%158, %c0_58, %c0_59] : memref<8x2x1xf32, #tpu.memory_space<vmem>>, vector<1x2x1xf32>
    %160 = vector.shape_cast %159 : vector<1x2x1xf32> to vector<2x1xf32>
    %161 = vector.broadcast %160 : vector<2x1xf32> to vector<2x16xf32>
    %162 = arith.mulf %161, %157 : vector<2x16xf32>
    %163 = arith.addf %140, %162 : vector<2x16xf32>
    %164 = arith.addf %141, %160 : vector<2x1xf32>
    %c7_i32 = arith.constant 7 : i32
    %165 = arith.index_cast %c7_i32 : i32 to index
    %c0_60 = arith.constant 0 : index
    %c0_61 = arith.constant 0 : index
    %166 = vector.load %arg1[%165, %c0_60, %c0_61] : memref<8x2x32xf32, #tpu.memory_space<vmem>>, vector<1x2x32xf32>
    %167 = vector.shape_cast %166 : vector<1x2x32xf32> to vector<2x32xf32>
    %cst_62 = arith.constant dense<0.000000e+00> : vector<2x16xf32>
    %168 = tpu.matmul %167, %0, %cst_62 {dimension_numbers = #tpu.dot_dimension_numbers<[1], [0], [0], [1], [0, 0, 1, 1], [], []>} : vector<2x32xf32>, vector<32x16xf32>, vector<2x16xf32> -> vector<2x16xf32>
    %169 = vector.broadcast %1 : vector<1x16xf32> to vector<2x16xf32>
    %170 = arith.addf %168, %169 : vector<2x16xf32>
    %cst_63 = arith.constant 0.000000e+00 : f32
    %171 = vector.broadcast %cst_63 : f32 to vector<2x16xf32>
    %172 = arith.maximumf %170, %171 : vector<2x16xf32>
    %173 = math.absf %170 : vector<2x16xf32>
    %cst_64 = arith.constant 0.000000e+00 : f32
    %174 = vector.broadcast %cst_64 : f32 to vector<2x16xf32>
    %175 = arith.subf %174, %173 : vector<2x16xf32>
    %176 = math.exp %175 : vector<2x16xf32>
    %177 = math.log1p %176 : vector<2x16xf32>
    %178 = arith.addf %172, %177 : vector<2x16xf32>
    %cst_65 = arith.constant 0.693147182 : f32
    %179 = vector.broadcast %cst_65 : f32 to vector<2x16xf32>
    %180 = arith.subf %178, %179 : vector<2x16xf32>
    %181 = arith.index_cast %c7_i32 : i32 to index
    %c0_66 = arith.constant 0 : index
    %c0_67 = arith.constant 0 : index
    %182 = vector.load %arg2[%181, %c0_66, %c0_67] : memref<8x2x1xf32, #tpu.memory_space<vmem>>, vector<1x2x1xf32>
    %183 = vector.shape_cast %182 : vector<1x2x1xf32> to vector<2x1xf32>
    %184 = vector.broadcast %183 : vector<2x1xf32> to vector<2x16xf32>
    %185 = arith.mulf %184, %180 : vector<2x16xf32>
    %186 = arith.addf %163, %185 : vector<2x16xf32>
    %187 = arith.addf %164, %183 : vector<2x1xf32>
    %c8_i32 = arith.constant 8 : i32
    %c0_68 = arith.constant 0 : index
    %c0_69 = arith.constant 0 : index
    %188 = vector.load %arg5[%c0_68, %c0_69] : memref<16x1xf32, #tpu.memory_space<vmem>>, vector<16x1xf32>
    %cst_70 = arith.constant dense<0.000000e+00> : vector<2x1xf32>
    %189 = tpu.matmul %186, %188, %cst_70 {dimension_numbers = #tpu.dot_dimension_numbers<[1], [0], [0], [1], [0, 0, 1, 1], [], []>} : vector<2x16xf32>, vector<16x1xf32>, vector<2x1xf32> -> vector<2x1xf32>
    %c0_71 = arith.constant 0 : index
    %c0_72 = arith.constant 0 : index
    %190 = vector.load %arg6[%c0_71, %c0_72] : memref<1x1xf32, #tpu.memory_space<vmem>>, vector<1x1xf32>
    %191 = vector.broadcast %190 : vector<1x1xf32> to vector<2x1xf32>
    %192 = arith.mulf %187, %191 : vector<2x1xf32>
    %193 = arith.addf %189, %192 : vector<2x1xf32>
    %c0_73 = arith.constant 0 : index
    %c0_74 = arith.constant 0 : index
    %194 = vector.load %arg7[%c0_73, %c0_74] : memref<2x1xf32, #tpu.memory_space<vmem>>, vector<2x1xf32>
    tpu.vector_store %arg7[%c0_73, %c0_74], %193 {strides = array<i32>} : memref<2x1xf32, #tpu.memory_space<vmem>>, vector<2x1xf32>,
    return
  }
  func.func @transform_0(%arg0: i32) -> (i32, i32, i32) {
    %c0_i32 = arith.constant 0 : i32
    %c0_i32_0 = arith.constant 0 : i32
    %c0_i32_1 = arith.constant 0 : i32
    return %c0_i32, %arg0, %c0_i32_0 : i32, i32, i32
  }
  func.func @transform_1(%arg0: i32) -> (i32, i32, i32) {
    %c0_i32 = arith.constant 0 : i32
    %c0_i32_0 = arith.constant 0 : i32
    %c0_i32_1 = arith.constant 0 : i32
    return %c0_i32, %arg0, %c0_i32_0 : i32, i32, i32
  }
  func.func @transform_2(%arg0: i32) -> (i32, i32) {
    %c0_i32 = arith.constant 0 : i32
    %c0_i32_0 = arith.constant 0 : i32
    %c0_i32_1 = arith.constant 0 : i32
    return %c0_i32, %c0_i32_0 : i32, i32
  }
  func.func @transform_3(%arg0: i32) -> (i32, i32) {
    %c0_i32 = arith.constant 0 : i32
    %c0_i32_0 = arith.constant 0 : i32
    %c0_i32_1 = arith.constant 0 : i32
    return %c0_i32, %c0_i32_0 : i32, i32
  }
  func.func @transform_4(%arg0: i32) -> (i32, i32) {
    %c0_i32 = arith.constant 0 : i32
    %c0_i32_0 = arith.constant 0 : i32
    %c0_i32_1 = arith.constant 0 : i32
    return %c0_i32, %c0_i32_0 : i32, i32
  }
  func.func @transform_5(%arg0: i32) -> (i32, i32) {
    %c0_i32 = arith.constant 0 : i32
    %c0_i32_0 = arith.constant 0 : i32
    %c0_i32_1 = arith.constant 0 : i32
    return %c0_i32, %c0_i32_0 : i32, i32
  }
  func.func @transform_6(%arg0: i32) -> (i32, i32) {
    %c0_i32 = arith.constant 0 : i32
    %c0_i32_0 = arith.constant 0 : i32
    return %arg0, %c0_i32 : i32, i32
  }
}

</mosaic_0001>

<bundles_post_ra>
// kernel: tpu_custom_call.1
= control target key start
LH: loop header
LB: loop body
LE: loop exit
PB: predicated region body
PF: predicated region fallthrough
CT: control target
= control target key end

     0   :  { %v1193_v0 = vmov 0.0|0.0   ;;  %vm1194_vm0 = vmmov 0   ;;  %v1195_v6 = vmov 0.0   ;;  %v1196_v7 = vmov 0   ;;  %s1417_s2 = inlined_call_operand.vmem [shape: f32[32,16], index: 2, kind: input, shape index: {}]   ;;  %s1418_s1 = inlined_call_operand.vmem [shape: f32[8,2,1], index: 1, kind: input, shape index: {}]   ;;  %s1419_s0 = inlined_call_operand.vmem [shape: f32[8,2,32], index: 0, kind: input, shape index: {}]   ;;  %s1420_s4 = inlined_call_operand.vmem [shape: f32[16,1], index: 4, kind: input, shape index: {}]   ;;  %s1421_s5 = inlined_call_operand.<no memory space> [shape: f32[1,1], index: 5, kind: input, shape index: {}]   ;;  %s1422_s3 = inlined_call_operand.vmem [shape: f32[1,16], index: 3, kind: input, shape index: {}]   ;;  %s1423_s6 = inlined_call_operand.vmem [shape: f32[2,1], index: 6, kind: output, shape index: {}]  }
   0x1   :  { %1104 = vmatprep.subr.bf16.mxu0 %v1193_v0  ;;  %1110 = vmatprep.subr.bf16.mxu1 %v1193_v0  ;;  %v25_v1 = vld [vmem:[%s1417_s2] sm:$0xff]  ;;  %v26_v2 = vld [vmem:[%s1417_s2 + $0x8] sm:$0xff]  ;;  %v27_v3 = vld [vmem:[%s1417_s2 + $0x10] sm:$0xff]  ;;  %vm37_vm1 = vcmask 261120   ;;  %v11_v35 = vstv %s1421_s5  ;;  %vm853_vm10 = vcmask 130048   ;;  %vm927_vm11 = vcmask 1024  }
   0x2   :  { %v1243_v4 = vpack.c.bf16 %v26_v2, %v25_v1  ;;  %v28_v5 = vld [vmem:[%s1417_s2 + $0x18] sm:$0xff]  ;;  %1017 = vmatprep.mubr.msk.f32.mxu0 %vm1194_vm0, %v1195_v6  ;;  %1028 = vmatprep.mubr.msk.f32.mxu1 %vm1194_vm0, %v1195_v6  ;;  %v127_v9 = vld [vmem:[%s1418_s1] sm:$0x3]  ;;  %v939_v10 = vld [vmem:[%s1418_s1 + $0x2] sm:$0x3] }
   0x3   :  { %1159 = vset.pattern.permute.xlu0 %v1196_v7  ;;  %1160 = vset.pattern.permute.xlu1 %v1196_v7  ;;  %v1254_v8 = vpack.c.bf16 %v28_v5, %v27_v3  ;;  %v943_v11 = vld [vmem:[%s1418_s1 + $0x4] sm:$0x3]  ;;  %v236_v12 = vadd.f32 %v939_v10, %v127_v9  ;;  %v947_v13 = vld [vmem:[%s1418_s1 + $0x6] sm:$0x3]  ;;  %v30_v14 = vld [vmem:[%s1419_s0] sm:$0x3] }
   0x4   :  { %1106 = vmatpush3.bf16.msra.mxu0 %v1243_v4  ;;  %1112 = vmatpush3.bf16.msra.mxu1 %v1243_v4  ;;  %v936_v15 = vld [vmem:[%s1419_s0 + $0x2] sm:$0x3]  ;;  %v951_v18 = vld [vmem:[%s1418_s1 + $0x8] sm:$0x3]  ;;  %v955_v20 = vld [vmem:[%s1418_s1 + $0xa] sm:$0x3] }
   0x5   :  { %1107 = vmatprep.subr.bf16.mxu0 %v1193_v0  ;;  %1113 = vmatprep.subr.bf16.mxu1 %v1193_v0  ;;  %v337_v16 = vadd.f32 %v943_v11, %v236_v12  ;;  %v959_v22 = vld [vmem:[%s1418_s1 + $0xc] sm:$0x3]  ;;  %v940_v23 = vld [vmem:[%s1419_s0 + $0x4] sm:$0x3]  ;;  %v944_v24 = vld [vmem:[%s1419_s0 + $0x6] sm:$0x3] }
   0x6   :  { %130 = vperm.xlu0 %1159, %v127_v9   ;;  %332 = vperm.xlu1 %1160, %v943_v11   ;;  %v963_v26 = vld [vmem:[%s1418_s1 + $0xe] sm:$0x3]  ;;  %v948_v28 = vld [vmem:[%s1419_s0 + $0x8] sm:$0x3]  ;;  %v952_v29 = vld [vmem:[%s1419_s0 + $0xa] sm:$0x3] }
   0x7   :  { %v438_v17 = vadd.f32 %v947_v13, %v337_v16  ;;  %v956_v30 = vld [vmem:[%s1419_s0 + $0xc] sm:$0x3]  ;;  %v960_v31 = vld [vmem:[%s1419_s0 + $0xe] sm:$0x3]  ;;  %v843_v32 = vld [vmem:[%s1420_s4] sm:$0xff] }
   0x8   :  { %1109 = vmatpush3.bf16.msra.mxu0 %v1254_v8  ;;  %1115 = vmatpush3.bf16.msra.mxu1 %v1254_v8  ;;  %v844_v33 = vld [vmem:[%s1420_s4 + $0x8] sm:$0xff]  ;;  %12 = vst [vmem:[#allocation2] sm:$0x1] %v11_v35  ;;  %v933_v36 = vld [vmem:[%s1422_s3] ss:$0 sm:$0xff] }
   0x9   :  { %1116 = vmatprep.subr.bf16.mxu0 %v1193_v0  ;;  %1122 = vmatprep.subr.bf16.mxu1 %v1193_v0  ;;  %v539_v19 = vadd.f32 %v951_v18, %v438_v17  ;;  %v1153_v34 = vpack.c.bf16 %v844_v33, %v843_v32 }
   0xa   :  { %231 = vperm.xlu0 %1159, %v939_v10   ;;  %433 = vperm.xlu1 %1160, %v947_v13  }
   0xb   :  { %1018 = vmatmul.mubr.msk.f32.vlgmr.msra.gmra.mrb[0].mxu0 %vm37_vm1, %v30_v14  ;;  %1029 = vmatmul.mubr.msk.f32.vlgmr.msra.gmra.mrb[0].mxu1 %vm37_vm1, %v936_v15  ;;  %v640_v21 = vadd.f32 %v955_v20, %v539_v19 }
   0xc   :  { %1118 = vmatpush3.bf16.msra.mxu0 %v1243_v4  ;;  %1124 = vmatpush3.bf16.msra.mxu1 %v1243_v4 }
   0xd   :  { %1119 = vmatprep.subr.bf16.mxu0 %v1193_v0  ;;  %1125 = vmatprep.subr.bf16.mxu1 %v1193_v0  ;;  %v741_v25 = vadd.f32 %v959_v22, %v640_v21 }
   0xe   :  { %1039 = vmatprep.mubr.msk.f32.mxu0 %vm1194_vm0, %v1195_v6  ;;  %1050 = vmatprep.mubr.msk.f32.mxu1 %vm1194_vm0, %v1195_v6 }
   0xf   :  { %534 = vperm.xlu0 %1159, %v951_v18   ;;  %635 = vperm.xlu1 %1160, %v955_v20   ;;  %v1312_v27 = vadd.f32 %v963_v26, %v741_v25 }
  0x10   :  { %1121 = vmatpush3.bf16.msra.mxu0 %v1254_v8  ;;  %1127 = vmatpush3.bf16.msra.mxu1 %v1254_v8 }
  0x11   :  { %1128 = vmatprep.subr.bf16.mxu0 %v1193_v0  ;;  %1134 = vmatprep.subr.bf16.mxu1 %v1193_v0 }
  0x13   :  { %1040 = vmatmul.mubr.msk.f32.vlgmr.msra.gmra.mrb[2].mxu0 %vm37_vm1, %v940_v23  ;;  %1051 = vmatmul.mubr.msk.f32.vlgmr.msra.gmra.mrb[2].mxu1 %vm37_vm1, %v944_v24 }
  0x14   :  { %1130 = vmatpush3.bf16.msra.mxu0 %v1243_v4  ;;  %1136 = vmatpush3.bf16.msra.mxu1 %v1243_v4 }
  0x15   :  { %1131 = vmatprep.subr.bf16.mxu0 %v1193_v0  ;;  %1137 = vmatprep.subr.bf16.mxu1 %v1193_v0 }
  0x16   :  { %1061 = vmatprep.mubr.msk.f32.mxu0 %vm1194_vm0, %v1195_v6  ;;  %1072 = vmatprep.mubr.msk.f32.mxu1 %vm1194_vm0, %v1195_v6 }
  0x17   :  { %736 = vperm.xlu0 %1159, %v959_v22   ;;  %837 = vperm.xlu1 %1160, %v963_v26  }
  0x18   :  { %1133 = vmatpush3.bf16.msra.mxu0 %v1254_v8  ;;  %1139 = vmatpush3.bf16.msra.mxu1 %v1254_v8 }
  0x19   :  { %1140 = vmatprep.subr.bf16.mxu0 %v1193_v0  ;;  %1146 = vmatprep.subr.bf16.mxu1 %v1193_v0 }
  0x1b   :  { %1062 = vmatmul.mubr.msk.f32.vlgmr.msra.gmra.mrb[4].mxu0 %vm37_vm1, %v948_v28  ;;  %1073 = vmatmul.mubr.msk.f32.vlgmr.msra.gmra.mrb[4].mxu1 %vm37_vm1, %v952_v29 }
  0x1c   :  { %1142 = vmatpush3.bf16.msra.mxu0 %v1243_v4  ;;  %1148 = vmatpush3.bf16.msra.mxu1 %v1243_v4 }
  0x1d   :  { %1143 = vmatprep.subr.bf16.mxu0 %v1193_v0  ;;  %1149 = vmatprep.subr.bf16.mxu1 %v1193_v0 }
  0x1e   :  { %1083 = vmatprep.mubr.msk.f32.mxu0 %vm1194_vm0, %v1195_v6  ;;  %1094 = vmatprep.mubr.msk.f32.mxu1 %vm1194_vm0, %v1195_v6 }
  0x20   :  { %1145 = vmatpush3.bf16.msra.mxu0 %v1254_v8  ;;  %1151 = vmatpush3.bf16.msra.mxu1 %v1254_v8 }
  0x21   :  { %1152 = vmatprep.subr.bf16.mxu0 %v1193_v0 }
  0x23   :  { %1084 = vmatmul.mubr.msk.f32.vlgmr.msra.gmra.mrb[6].mxu0 %vm37_vm1, %v956_v30  ;;  %1095 = vmatmul.mubr.msk.f32.vlgmr.msra.gmra.mrb[6].mxu1 %vm37_vm1, %v960_v31 }
  0x24   :  { %1101 = vmatprep.mubr.msk.f32.mxu0 %vm1194_vm0, %v1195_v6  ;;  %1154 = vmatpush3.bf16.msra.mxu0 %v1153_v34 }
  0xde   :  { %v107_v37 = vpop.f32.mrb[0].mxu0  ;;  %v207_v38 = vpop.f32.mrb[0].mxu1 }
  0xdf   :  { %v1369_v39 = vadd.f32 %v933_v36, %v107_v37  ;;  %v1371_v40 = vadd.f32 %v933_v36, %v207_v38  ;;  %v1019_v41 = vpop.f32.mrb[1].mxu0  ;;  %v1030_v42 = vpop.f32.mrb[1].mxu1 }
  0xe0   :  { %v131_v38 = vpop.permute.xlu0 %130 }
  0xe1   :  { %v112_v43 = vand.u32 2147483647, %v1369_v39  ;;  %v212_v44 = vand.u32 2147483647, %v1371_v40  ;;  %v111_v37 = vmax.f32 %v1369_v39, 0.0 }
  0xe3   :  { %v113_v45 = vsub.f32 0.0, %v112_v43  ;;  %v213_v46 = vsub.f32 0.0, %v212_v44 }
  0xe5   :  { %v114_v47 = vmul.f32 1.442695, %v113_v45  ;;  %v214_v48 = vmul.f32 1.442695, %v213_v46 }
  0xe6   :  { %v308_v49 = vpop.f32.mrb[2].mxu0  ;;  %v409_v50 = vpop.f32.mrb[2].mxu1 }
  0xe7   :  { %1161 = vpow2.f32 %v114_v47  ;;  %v1375_v51 = vadd.f32 %v933_v36, %v308_v49  ;;  %v1377_v52 = vadd.f32 %v933_v36, %v409_v50  ;;  %v1041_v53 = vpop.f32.mrb[3].mxu0  ;;  %v1052_v54 = vpop.f32.mrb[3].mxu1  ;;  %v211_v49 = vmax.f32 %v1371_v40, 0.0 }
  0xe8   :  { %1163 = vpow2.f32 %v214_v48 }
  0xe9   :  { %v313_v55 = vand.u32 2147483647, %v1375_v51  ;;  %v414_v56 = vand.u32 2147483647, %v1377_v52 }
  0xeb   :  { %v314_v57 = vsub.f32 0.0, %v313_v55  ;;  %v415_v58 = vsub.f32 0.0, %v414_v56 }
  0xed   :  { %v315_v59 = vmul.f32 1.442695, %v314_v57  ;;  %v416_v60 = vmul.f32 1.442695, %v415_v58 }
  0xee   :  { %v510_v61 = vpop.f32.mrb[4].mxu0  ;;  %v611_v62 = vpop.f32.mrb[4].mxu1 }
  0xef   :  { %1165 = vpow2.f32 %v315_v59  ;;  %v1381_v63 = vadd.f32 %v933_v36, %v510_v61  ;;  %v1383_v0 = vadd.f32 %v933_v36, %v611_v62  ;;  %v1063_v1 = vpop.f32.mrb[5].mxu0  ;;  %v1074_v2 = vpop.f32.mrb[5].mxu1 }
  0xf0   :  { %1167 = vpow2.f32 %v416_v60  ;;  %v232_v60 = vpop.permute.xlu0 %231 }
  0xf1   :  { %v1162_v3 = vpop.eup %1161  ;;  %v515_v4 = vand.u32 2147483647, %v1381_v63  ;;  %v616_v5 = vand.u32 2147483647, %v1383_v0 }
  0xf2   :  { %v1164_v6 = vpop.eup %1163  ;;  %v116_v7 = vadd.f32 1.0, %v1162_v3  ;;  %v119_v19 = vmul.f32 -0.5, %v1162_v3  ;;  %v122_v25 = vand.u32 2147483647, %v1162_v3 }
  0xf3   :  { %v516_v8 = vsub.f32 0.0, %v515_v4  ;;  %v617_v9 = vsub.f32 0.0, %v616_v5  ;;  %v216_v10 = vadd.f32 1.0, %v1164_v6  ;;  %v219_v20 = vmul.f32 -0.5, %v1164_v6 }
  0xf4   :  { %1169 = vlog2.f32 %v116_v7  ;;  %v120_v30 = vadd.f32 1.0, %v119_v19  ;;  %v222_v35 = vand.u32 2147483647, %v1164_v6  ;;  %vm123_vm2 = vcmp.lt.f32.partialorder %v122_v25, 0.0004427343 }
  0xf5   :  { %v517_v11 = vmul.f32 1.442695, %v516_v8  ;;  %v618_v12 = vmul.f32 1.442695, %v617_v9  ;;  %1171 = vlog2.f32 %v216_v10  ;;  %v220_v32 = vadd.f32 1.0, %v219_v20 }
  0xf6   :  { %v712_v13 = vpop.f32.mrb[6].mxu0  ;;  %v813_v14 = vpop.f32.mrb[6].mxu1  ;;  %v121_v44 = vmul.f32 %v1162_v3, %v120_v30  ;;  %vm223_vm3 = vcmp.lt.f32.partialorder %v222_v35, 0.0004427343  ;;  %v312_v10 = vmax.f32 %v1375_v51, 0.0 }
  0xf7   :  { %1173 = vpow2.f32 %v517_v11  ;;  %v1387_v15 = vadd.f32 %v933_v36, %v712_v13  ;;  %v1389_v16 = vadd.f32 %v933_v36, %v813_v14  ;;  %v1085_v17 = vpop.f32.mrb[7].mxu0  ;;  %v1096_v18 = vpop.f32.mrb[7].mxu1  ;;  %v221_v46 = vmul.f32 %v1164_v6, %v220_v32 }
  0xf8   :  { %1175 = vpow2.f32 %v618_v12  ;;  %v413_v14 = vmax.f32 %v1377_v52, 0.0  ;;  %v333_v18 = vpop.permute.xlu1 %332  ;;  %v514_v32 = vmax.f32 %v1381_v63, 0.0 }
  0xf9   :  { %v1166_v21 = vpop.eup %1165  ;;  %v717_v22 = vand.u32 2147483647, %v1387_v15  ;;  %v818_v23 = vand.u32 2147483647, %v1389_v16 }
  0xfa   :  { %v1393_v24 = vpop.eup %1167  ;;  %v317_v26 = vadd.f32 1.0, %v1166_v21  ;;  %v320_v41 = vmul.f32 -0.5, %v1166_v21  ;;  %v323_v61 = vand.u32 2147483647, %v1166_v21 }
  0xfb   :  { %v718_v28 = vsub.f32 0.0, %v717_v22  ;;  %v819_v29 = vsub.f32 0.0, %v818_v23  ;;  %v418_v31 = vadd.f32 1.0, %v1393_v24  ;;  %v421_v47 = vmul.f32 -0.5, %v1393_v24 }
  0xfc   :  { %1177 = vlog2.f32 %v317_v26  ;;  %v321_v55 = vadd.f32 1.0, %v320_v41  ;;  %v424_v2 = vand.u32 2147483647, %v1393_v24  ;;  %vm324_vm4 = vcmp.lt.f32.partialorder %v323_v61, 0.0004427343  ;;  %v434_v35 = vpop.permute.xlu1 %433 }
  0xfd   :  { %v719_v33 = vmul.f32 1.442695, %v718_v28  ;;  %v820_v34 = vmul.f32 1.442695, %v819_v29  ;;  %1179 = vlog2.f32 %v418_v31  ;;  %v422_v62 = vadd.f32 1.0, %v421_v47 }
  0xfe   :  { %v1170_v36 = vpop.eup %1169  ;;  %v322_v4 = vmul.f32 %v1166_v21, %v321_v55  ;;  %vm425_vm5 = vcmp.lt.f32.partialorder %v424_v2, 0.0004427343 }
  0xff   :  { %v1172_v42 = vpop.eup %1171  ;;  %1181 = vpow2.f32 %v719_v33  ;;  %v118_v43 = vmul.f32 0.6931472, %v1170_v36  ;;  %v423_v12 = vmul.f32 %v1393_v24, %v422_v62  ;;  %v716_v62 = vmax.f32 %v1387_v15, 0.0 }
 0x100   :  { %1183 = vpow2.f32 %v820_v34  ;;  %v218_v45 = vmul.f32 0.6931472, %v1172_v42 }
 0x101   :  { %v1174_v48 = vpop.eup %1173  ;;  %v124_v50 = vsel %vm123_vm2, %v121_v44, %v118_v43 }
 0x102   :  { %v1399_v53 = vpop.eup %1175  ;;  %v125_v39 = vadd.f32 %v124_v50, %v111_v37  ;;  %v224_v54 = vsel %vm223_vm3, %v221_v46, %v218_v45  ;;  %v519_v56 = vadd.f32 1.0, %v1174_v48  ;;  %v522_v8 = vmul.f32 -0.5, %v1174_v48 }
 0x103   :  { %v225_v57 = vadd.f32 %v224_v54, %v211_v49  ;;  %v620_v58 = vadd.f32 1.0, %v1399_v53  ;;  %v623_v9 = vmul.f32 -0.5, %v1399_v53  ;;  %v525_v23 = vand.u32 2147483647, %v1174_v48 }
 0x104   :  { %v935_v59 = vadd.f32 -0.6931472, %v125_v39  ;;  %1185 = vlog2.f32 %v519_v56  ;;  %v523_v28 = vadd.f32 1.0, %v522_v8  ;;  %v626_v24 = vand.u32 2147483647, %v1399_v53 }
 0x105   :  { %v938_v1 = vadd.f32 -0.6931472, %v225_v57  ;;  %1187 = vlog2.f32 %v620_v58  ;;  %v624_v29 = vadd.f32 1.0, %v623_v9  ;;  %vm526_vm6 = vcmp.lt.f32.partialorder %v525_v23, 0.0004427343 }
 0x106   :  { %v1178_v40 = vpop.eup %1177  ;;  %v133_v3 = vmul.f32 %v935_v59, %v131_v38  ;;  %v524_v37 = vmul.f32 %v1174_v48, %v523_v28  ;;  %v615_v46 = vmax.f32 %v1383_v0, 0.0  ;;  %vm627_vm7 = vcmp.lt.f32.partialorder %v626_v24, 0.0004427343  ;;  %v535_v48 = vpop.permute.xlu0 %534 }
 0x107   :  { %v1180_v5 = vpop.eup %1179  ;;  %v234_v6 = vmul.f32 %v938_v1, %v232_v60  ;;  %v319_v7 = vmul.f32 0.6931472, %v1178_v40  ;;  %v625_v38 = vmul.f32 %v1399_v53, %v624_v29  ;;  %v636_v1 = vpop.permute.xlu1 %635 }
 0x108   :  { %v420_v11 = vmul.f32 0.6931472, %v1180_v5 }
 0x109   :  { %v1182_v13 = vpop.eup %1181  ;;  %v235_v17 = vadd.f32 %v234_v6, %v133_v3  ;;  %v325_v19 = vsel %vm324_vm4, %v322_v4, %v319_v7  ;;  %v817_v6 = vmax.f32 %v1389_v16, 0.0 }
 0x10a   :  { %v1184_v20 = vpop.eup %1183  ;;  %v326_v21 = vadd.f32 %v325_v19, %v312_v10  ;;  %v426_v22 = vsel %vm425_vm5, %v423_v12, %v420_v11  ;;  %v721_v25 = vadd.f32 1.0, %v1182_v13  ;;  %v724_v41 = vmul.f32 -0.5, %v1182_v13 }
 0x10b   :  { %v427_v26 = vadd.f32 %v426_v22, %v413_v14  ;;  %v822_v51 = vadd.f32 1.0, %v1184_v20  ;;  %v825_v45 = vmul.f32 -0.5, %v1184_v20  ;;  %v727_v55 = vand.u32 2147483647, %v1182_v13  ;;  %v737_v14 = vpop.permute.xlu0 %736  ;;  %v964_v22 = vld [vmem:[#allocation2] ss:$0 sm:$0xff] }
 0x10c   :  { %v942_v30 = vadd.f32 -0.6931472, %v326_v21  ;;  %1189 = vlog2.f32 %v721_v25  ;;  %v725_v54 = vadd.f32 1.0, %v724_v41  ;;  %v828_v53 = vand.u32 2147483647, %v1184_v20 }
 0x10d   :  { %v946_v31 = vadd.f32 -0.6931472, %v427_v26  ;;  %1191 = vlog2.f32 %v822_v51  ;;  %v826_v57 = vadd.f32 1.0, %v825_v45  ;;  %vm728_vm8 = vcmp.lt.f32.partialorder %v727_v55, 0.0004427343 }
 0x10e   :  { %v1186_v52 = vpop.eup %1185  ;;  %v335_v33 = vmul.f32 %v942_v30, %v333_v18  ;;  %v726_v2 = vmul.f32 %v1182_v13, %v725_v54  ;;  %vm829_vm9 = vcmp.lt.f32.partialorder %v828_v53, 0.0004427343  ;;  %v838_v18 = vpop.permute.xlu1 %837 }
 0x10f   :  { %v1188_v34 = vpop.eup %1187  ;;  %v521_v36 = vmul.f32 0.6931472, %v1186_v52  ;;  %v436_v43 = vmul.f32 %v946_v31, %v434_v35  ;;  %v827_v5 = vmul.f32 %v1184_v20, %v826_v57  ;;  %v852_v20 = vmul.f32 %v964_v22, %v1312_v27 }
 0x110   :  { %v336_v42 = vadd.f32 %v335_v33, %v235_v17  ;;  %v622_v44 = vmul.f32 0.6931472, %v1188_v34 }
 0x111   :  { %v527_v47 = vsel %vm526_vm6, %v524_v37, %v521_v36 }
 0x112   :  { %v437_v49 = vadd.f32 %v436_v43, %v336_v42  ;;  %v528_v50 = vadd.f32 %v527_v47, %v514_v32  ;;  %v628_v63 = vsel %vm627_vm7, %v625_v38, %v622_v44 }
 0x113   :  { %v629_v39 = vadd.f32 %v628_v63, %v615_v46 }
 0x114   :  { %v950_v56 = vadd.f32 -0.6931472, %v528_v50 }
 0x115   :  { %v954_v58 = vadd.f32 -0.6931472, %v629_v39 }
 0x116   :  { %v1190_v59 = vpop.eup %1189  ;;  %v537_v60 = vmul.f32 %v950_v56, %v535_v48 }
 0x117   :  { %v1192_v61 = vpop.eup %1191  ;;  %v723_v0 = vmul.f32 0.6931472, %v1190_v59  ;;  %v638_v3 = vmul.f32 %v954_v58, %v636_v1 }
 0x118   :  { %v538_v40 = vadd.f32 %v537_v60, %v437_v49  ;;  %v824_v4 = vmul.f32 0.6931472, %v1192_v61 }
 0x119   :  { %v729_v7 = vsel %vm728_vm8, %v726_v2, %v723_v0 }
 0x11a   :  { %v639_v8 = vadd.f32 %v638_v3, %v538_v40  ;;  %v730_v9 = vadd.f32 %v729_v7, %v716_v62  ;;  %v830_v10 = vsel %vm829_vm9, %v827_v5, %v824_v4 }
 0x11b   :  { %v831_v11 = vadd.f32 %v830_v10, %v817_v6 }
 0x11c   :  { %v958_v12 = vadd.f32 -0.6931472, %v730_v9 }
 0x11d   :  { %v962_v17 = vadd.f32 -0.6931472, %v831_v11 }
 0x11e   :  { %v739_v15 = vmul.f32 %v958_v12, %v737_v14 }
 0x11f   :  { %v840_v13 = vmul.f32 %v962_v17, %v838_v18 }
 0x120   :  { %v740_v19 = vadd.f32 %v739_v15, %v639_v8 }
 0x122   :  { %v841_v21 = vadd.f32 %v840_v13, %v740_v19 }
 0x124   :  { %1102 = vmatmul.mubr.msk.f32.vlgmr.msra.gmra.mrb[8].mxu0 %vm853_vm10, %v841_v21 }
 0x1f7   :  { %v923_v16 = vpop.f32.mrb[8].mxu0 }
 0x1f8   :  { %v924_v23 = vadd.f32 %v923_v16, %v852_v20  ;;  %v1103_v25 = vpop.f32.mrb[9].mxu0 }
 0x1fa   :  { %928 = vst.msk [vmem:[%s1423_s6] sm:$0x3] %vm927_vm11, %v924_v23 }

</bundles_post_ra>
